<compile_context>
chip_gen: v5e
topology: v5e:2x2
jax: 0.10.0
libtpu: 0.0.40
codegen_flags: <defaults>
</compile_context>

<pallas_src>
import jax
import jax.numpy as jnp
from jax.experimental import pallas as pl
from jax.experimental.pallas import tpu as pltpu


def _rotate_block_kernel(corr_ref, feat_ref, out_ref):
    """Per-(batch, N-tile) block: out[n,k,c] = sum_l corr[k,l] * feat[n,l,c]."""
    corr = corr_ref[...]                                    # [K, K]
    feat = feat_ref[...]                                    # [TN, K, C]
    tn = feat.shape[0]
    # Canonical batched matmul (batch = point index n), same form as the
    # flash-attention 'bqk,bkd->bqd' pattern, so it lowers cleanly on Mosaic
    # and keeps both input and output tiles in native [N, K, C] layout.
    corr_b = jnp.broadcast_to(corr[None, :, :], (tn,) + corr.shape)
    acc = jnp.einsum(
        "nkl,nlc->nkc", corr_b, feat, preferred_element_type=jnp.float32
    )
    out_ref[...] = acc.astype(out_ref.dtype)


def _soft_assignment(points_base, weights, sigma):
    """Tiny glue: rotate kernel points + Gaussian soft re-assignment [B,K,K]."""
    rotated = jnp.einsum("kd,bde->bke", points_base, weights)          # [B,K,3]
    diff = rotated[:, :, None, :] - points_base[None, None, :, :]      # [B,K,K,3]
    d2 = jnp.sum(diff * diff, axis=-1)                                 # [B,K,K]
    corr = jnp.exp(-d2 / (2.0 * sigma * sigma))
    corr = corr / (jnp.sum(corr, axis=-1, keepdims=True) + 1e-8)
    return corr


def _pick_block_n(n, k, c, itemsize, target_bytes=2 * 1024 * 1024):
    """Largest divisor of n whose padded VMEM tile stays under target_bytes.

    Accounts for sublane (8) / lane (128) padding of the trailing [K, C] dims
    so double-buffered in+out tiles stay well inside the scoped-VMEM default
    on all generations (16 MiB v5e, 32 MiB v6e/v7x, 64 MiB physical v7x).
    """
    padded_k = -(-k // 8) * 8
    padded_c = -(-c // 128) * 128
    row_bytes = max(1, padded_k * padded_c * itemsize)
    cap = max(8, target_bytes // row_bytes)
    bn = int(min(n, cap))
    while n % bn:
        bn -= 1
    return bn


def kernel_rotate(features, points_base, weights, *, sigma=0.3,
                  block_n=None, compute_dtype=None, out_dtype=None,
                  vmem_limit_bytes=None):
    """KernelRotate forward.

    features:    [B, N, K, C] -- features grouped onto K kernel points
    points_base: [K, 3]       -- base kernel point coordinates
    weights:     [B, 3, 3]    -- per-sample rotation matrices
    returns:     [B, N, K, C] (dtype = out_dtype or features.dtype)
    """
    B, N, K, C = features.shape
    if out_dtype is None:
        out_dtype = features.dtype

    corr = _soft_assignment(points_base, weights, sigma)               # [B,K,K]

    # Optional reduced-precision streaming (halves HBM read traffic); the
    # matmul still accumulates in f32.
    if compute_dtype is not None:
        features = features.astype(compute_dtype)
        corr = corr.astype(compute_dtype)
    else:
        corr = corr.astype(features.dtype)

    itemsize = jnp.dtype(features.dtype).itemsize
    if block_n is None:
        block_n = _pick_block_n(N, K, C, itemsize)
    grid = (B, N // block_n)

    flops = 2 * B * N * K * K * C
    bytes_accessed = itemsize * (2 * B * N * K * C + B * K * K)

    out = pl.pallas_call(
        _rotate_block_kernel,
        out_shape=jax.ShapeDtypeStruct((B, N, K, C), out_dtype),
        grid_spec=pltpu.PrefetchScalarGridSpec(
            num_scalar_prefetch=0,
            grid=grid,                       # (B outer, N-tiles inner)
            in_specs=[
                # corr block index is constant over the inner axis -> no
                # redundant per-step DMA of the [K, K] matrix.
                pl.BlockSpec((None, K, K), lambda b, n: (b, 0, 0)),
                pl.BlockSpec((None, block_n, K, C), lambda b, n: (b, n, 0, 0)),
            ],
            out_specs=pl.BlockSpec(
                (None, block_n, K, C), lambda b, n: (b, n, 0, 0)
            ),
        ),
        compiler_params=pltpu.CompilerParams(
            dimension_semantics=("parallel", "parallel"),
            vmem_limit_bytes=vmem_limit_bytes,
        ),
        cost_estimate=pl.CostEstimate(
            flops=flops, transcendentals=0, bytes_accessed=bytes_accessed
        ),
    )(corr, features)
    return out


if __name__ == "__main__":
    key = jax.random.PRNGKey(0)
    B, N, K, C = 2, 64, 16, 32
    k1, k2 = jax.random.split(key, 2)

    features = jax.random.normal(k1, (B, N, K, C), dtype=jnp.float32)
    points_base = jax.random.normal(k2, (K, 3), dtype=jnp.float32)

    # Deterministic per-sample rotation matrices (rotation about z-axis).
    angles = jnp.linspace(0.1, 1.0, B)
    c, s = jnp.cos(angles), jnp.sin(angles)
    zeros, ones = jnp.zeros_like(c), jnp.ones_like(c)
    weights = jnp.stack(
        [
            jnp.stack([c, -s, zeros], axis=-1),
            jnp.stack([s, c, zeros], axis=-1),
            jnp.stack([zeros, zeros, ones], axis=-1),
        ],
        axis=-2,
    ).astype(jnp.float32)                                              # [B,3,3]

    # Pure-JAX reference.
    corr_ref = _soft_assignment(points_base, weights, 0.3)
    ref = jnp.einsum("bkl,bnlc->bnkc", corr_ref, features)

    # f32 path (exact semantics).
    out = jax.block_until_ready(kernel_rotate(features, points_base, weights))
    assert out.shape == (B, N, K, C)
    assert jnp.allclose(out, ref, rtol=1e-5, atol=1e-5)

    # bf16 streaming path (halved HBM read traffic), looser tolerance.
    out_bf16 = jax.block_until_ready(
        kernel_rotate(features, points_base, weights,
                      compute_dtype=jnp.bfloat16)
    )
    assert out_bf16.shape == (B, N, K, C)
    assert jnp.allclose(out_bf16.astype(jnp.float32), ref, rtol=5e-2, atol=5e-2)

    print("KERNEL_OK")
</pallas_src>

<mosaic_0001>
module attributes {stable_mosaic.version = 11 : i64} {
  func.func @_rotate_block_kernel(%arg0: i32, %arg1: i32, %arg2: memref<1x16x16xf32, #tpu.memory_space<vmem>>, %arg3: memref<1x64x16x32xf32, #tpu.memory_space<vmem>>, %arg4: memref<1x64x16x32xf32, #tpu.memory_space<vmem>>) attributes {dimension_semantics = [#tpu.dimension_semantics<parallel>, #tpu.dimension_semantics<parallel>], iteration_bounds = array<i64: 2, 1>, scalar_prefetch = 0 : i64, scratch_operands = 0 : i64, tpu.core_type = #tpu.core_type<tc>, window_params = [{transform_indices = @transform_0, window_bounds = array<i64: 1, 16, 16>}, {transform_indices = @transform_1, window_bounds = array<i64: 1, 64, 16, 32>}, {transform_indices = @transform_2, window_bounds = array<i64: 1, 64, 16, 32>}]} {
    %c0 = arith.constant 0 : index
    %c0_0 = arith.constant 0 : index
    %c0_1 = arith.constant 0 : index
    %0 = vector.load %arg2[%c0, %c0_0, %c0_1] : memref<1x16x16xf32, #tpu.memory_space<vmem>>, vector<1x16x16xf32>
    %1 = vector.shape_cast %0 : vector<1x16x16xf32> to vector<16x16xf32>
    %c0_2 = arith.constant 0 : index
    %c0_3 = arith.constant 0 : index
    %c0_4 = arith.constant 0 : index
    %c0_5 = arith.constant 0 : index
    %2 = vector.load %arg3[%c0_2, %c0_3, %c0_4, %c0_5] : memref<1x64x16x32xf32, #tpu.memory_space<vmem>>, vector<1x64x16x32xf32>
    %3 = vector.shape_cast %2 : vector<1x64x16x32xf32> to vector<64x16x32xf32>
    %4 = vector.shape_cast %1 : vector<16x16xf32> to vector<1x16x16xf32>
    %5 = vector.shape_cast %4 : vector<1x16x16xf32> to vector<1x16x16xf32>
    %6 = vector.broadcast %5 : vector<1x16x16xf32> to vector<64x16x16xf32>
    "tpu.trace_start"() <{level = 10 : i32, message = "nkl,nlc->nkc"}> : () -> ()
    %cst = arith.constant dense<0.000000e+00> : vector<64x16x32xf32>
    %7 = tpu.matmul %6, %3, %cst {dimension_numbers = #tpu.dot_dimension_numbers<[2], [1], [1], [2], [0, 0, 0, 1, 1, 2], [0], [0]>} : vector<64x16x16xf32>, vector<64x16x32xf32>, vector<64x16x32xf32> -> vector<64x16x32xf32>
    "tpu.trace_stop"() : () -> ()
    %c0_6 = arith.constant 0 : index
    %c0_7 = arith.constant 0 : index
    %c0_8 = arith.constant 0 : index
    %c0_9 = arith.constant 0 : index
    %8 = vector.load %arg4[%c0_6, %c0_7, %c0_8, %c0_9] : memref<1x64x16x32xf32, #tpu.memory_space<vmem>>, vector<1x64x16x32xf32>
    %9 = vector.shape_cast %8 : vector<1x64x16x32xf32> to vector<64x16x32xf32>
    %10 = vector.shape_cast %7 : vector<64x16x32xf32> to vector<1x64x16x32xf32>
    tpu.vector_store %arg4[%c0_6, %c0_7, %c0_8, %c0_9], %10 {strides = array<i32>} : memref<1x64x16x32xf32, #tpu.memory_space<vmem>>, vector<1x64x16x32xf32>,
    return
  }
  func.func @transform_0(%arg0: i32, %arg1: i32) -> (i32, i32, i32) {
    %c0_i32 = arith.constant 0 : i32
    %c0_i32_0 = arith.constant 0 : i32
    %c0_i32_1 = arith.constant 0 : i32
    return %arg0, %c0_i32, %c0_i32_0 : i32, i32, i32
  }
  func.func @transform_1(%arg0: i32, %arg1: i32) -> (i32, i32, i32, i32) {
    %c0_i32 = arith.constant 0 : i32
    %c0_i32_0 = arith.constant 0 : i32
    %c0_i32_1 = arith.constant 0 : i32
    return %arg0, %arg1, %c0_i32, %c0_i32_0 : i32, i32, i32, i32
  }
  func.func @transform_2(%arg0: i32, %arg1: i32) -> (i32, i32, i32, i32) {
    %c0_i32 = arith.constant 0 : i32
    %c0_i32_0 = arith.constant 0 : i32
    %c0_i32_1 = arith.constant 0 : i32
    return %arg0, %arg1, %c0_i32, %c0_i32_0 : i32, i32, i32, i32
  }
}

</mosaic_0001>

<bundles_post_ra>
// kernel: tpu_custom_call.1
= control target key start
LH: loop header
LB: loop body
LE: loop exit
PB: predicated region body
PF: predicated region fallthrough
CT: control target
= control target key end

     0   :  { %s2261_s9 = smov 0   ;;  %s2263_s10 = smov 0   ;;  %s2957_s0 = inlined_call_operand.vmem [shape: f32[2,16,16], index: 0, kind: input, shape index: {}]   ;;  %s2958_s1 = inlined_call_operand.vmem [shape: f32[2,64,16,32], index: 1, kind: input, shape index: {}]   ;;  %s2959_s2 = inlined_call_operand.vmem [shape: f32[2,64,16,32], index: 2, kind: output, shape index: {}]  }
   0x1   :  { %s2265_s11 = smov 0  }
   0x2 LB: > { %s24_s12 = sadd.s32 1, %s2240_s10  ;;  %p2058_p0 = scmp.ge.s32.totalorder %s2244_s11, 1  ;;  %s2244_s11 = sphi %s2265_s11, %s12_s11   ;;  %s2240_s10 = sphi %s2263_s10, %s2961_s10   ;;  %s2236_s9 = sphi %s2261_s9, %s2960_s9  }
   0x3   : > { %p26_p1 = scmp.ge.s32.totalorder %s24_s12, 2  ;;  %p144_p2 = scmp.lt.s32.totalorder %s2244_s11, 3 }
   0x5   : > { %s2963_s12 = smov (%p26_p1, %s24_s12), 0  ;;  %p145_p3 = pnand %p2058_p0, %p144_p2 }
   0x6   : > { %p181_p4 = scmp.lt.s32.totalorder (!%p145_p3), %s2236_s9, 1 }
   0x7   : > { %148 = sbr.rel (%p145_p3) target bundleno = 403 (0x193), region = 28 }
   0xc   : > { %s2965_s9 = smov (!%p181_p4, %s2236_s9), 1  ;;  %vm338_vm0 = vcmask 130048   ;;  %vm1817_vm1 = vcmask 261120  }
   0xd   : > { %s2196_s13 = sshll.u32 %s2965_s9, 10  ;;  %s2195_s14 = sshll.u32 %s2965_s9, 4 }
   0xe   : > { %s2288_s17 = scalar_lea.vmem %s2958_s1, %s2196_s13  ;;  %s2293_s20 = scalar_lea.vmem %s2957_s0, %s2195_s14 }
   0xf   : > { %v215_v0 = vld [vmem:[%s2288_s17 + $0x28] sm:$0xff]  ;;  %v217_v1 = vld [vmem:[%s2288_s17 + $0x38] sm:$0xff]  ;;  %v214_v2 = vld [vmem:[%s2288_s17 + $0x20] sm:$0xff]  ;;  %s2520_s23 = scalar_lea.vmem %s2959_s2, %s2196_s13 }
  0x10   : > { %405 = vmatpush.msra.mxu2 %v215_v0  ;;  %428 = vmatpush.msra.mxu3 %v217_v1  ;;  %v216_v3 = vld [vmem:[%s2288_s17 + $0x30] sm:$0xff]  ;;  %v2300_v4 = vld [vmem:[%s2293_s20] sm:$0xff]  ;;  %v223_v5 = vld [vmem:[%s2288_s17 + $0x68] sm:$0xff] }
  0x11   : > { %v225_v6 = vld [vmem:[%s2288_s17 + $0x78] sm:$0xff]  ;;  %v211_v7 = vld [vmem:[%s2288_s17 + $0x8] sm:$0xff]  ;;  %v222_v9 = vld [vmem:[%s2288_s17 + $0x60] sm:$0xff] }
  0x12   : > { %406 = vmatpush.msra.mxu2 %v214_v2  ;;  %429 = vmatpush.msra.mxu3 %v216_v3  ;;  %v213_v8 = vld [vmem:[%s2288_s17 + $0x18] sm:$0xff]  ;;  %v210_v10 = vld [vmem:[%s2288_s17] sm:$0xff]  ;;  %v212_v11 = vld [vmem:[%s2288_s17 + $0x10] sm:$0xff] }
  0x13   : > { %2069 = vmatmul.msk.f32.vlgmr.msra.gmra.mxu2 %vm338_vm0, %v2300_v4  ;;  %2071 = vmatmul.msk.f32.vlgmr.msra.gmra.mxu3 %vm338_vm0, %v2300_v4  ;;  %v224_v12 = vld [vmem:[%s2288_s17 + $0x70] sm:$0xff]  ;;  %v219_v13 = vld [vmem:[%s2288_s17 + $0x48] sm:$0xff]  ;;  %v221_v14 = vld [vmem:[%s2288_s17 + $0x58] sm:$0xff] }
  0x14   : > { %497 = vmatpush.msrb.mxu2 %v223_v5  ;;  %520 = vmatpush.msrb.mxu3 %v225_v6  ;;  %v231_v15 = vld [vmem:[%s2288_s17 + $0xa8] sm:$0xff]  ;;  %v233_v16 = vld [vmem:[%s2288_s17 + $0xb8] sm:$0xff]  ;;  %v218_v18 = vld [vmem:[%s2288_s17 + $0x40] sm:$0xff] }
  0x15   : > { %359 = vmatpush.msra.mxu0 %v211_v7  ;;  %382 = vmatpush.msra.mxu1 %v213_v8  ;;  %v2323_v17 = vld [vmem:[%s2293_s20 + $0x8] sm:$0xff]  ;;  %v220_v19 = vld [vmem:[%s2288_s17 + $0x50] sm:$0xff]  ;;  %v229_v21 = vld [vmem:[%s2288_s17 + $0x98] sm:$0xff] }
  0x16   : > { %498 = vmatpush.msrb.mxu2 %v222_v9  ;;  %521 = vmatpush.msrb.mxu3 %v224_v12  ;;  %v227_v20 = vld [vmem:[%s2288_s17 + $0x88] sm:$0xff]  ;;  %v230_v22 = vld [vmem:[%s2288_s17 + $0xa0] sm:$0xff]  ;;  %v232_v23 = vld [vmem:[%s2288_s17 + $0xb0] sm:$0xff] }
  0x17   : > { %360 = vmatpush.msra.mxu0 %v210_v10  ;;  %383 = vmatpush.msra.mxu1 %v212_v11  ;;  %v226_v24 = vld [vmem:[%s2288_s17 + $0x80] sm:$0xff]  ;;  %v228_v25 = vld [vmem:[%s2288_s17 + $0x90] sm:$0xff]  ;;  %v239_v26 = vld [vmem:[%s2288_s17 + $0xe8] sm:$0xff] }
  0x18   : > { %2065 = vmatmul.msk.f32.vlgmr.msra.gmra.mxu0 %vm338_vm0, %v2300_v4  ;;  %2067 = vmatmul.msk.f32.vlgmr.msra.gmra.mxu1 %vm338_vm0, %v2300_v4  ;;  %v241_v27 = vld [vmem:[%s2288_s17 + $0xf8] sm:$0xff]  ;;  %v238_v28 = vld [vmem:[%s2288_s17 + $0xe0] sm:$0xff]  ;;  %v240_v29 = vld [vmem:[%s2288_s17 + $0xf0] sm:$0xff] }
  0x19   : > { %451 = vmatpush.msrb.mxu0 %v219_v13  ;;  %474 = vmatpush.msrb.mxu1 %v221_v14  ;;  %v235_v30 = vld [vmem:[%s2288_s17 + $0xc8] sm:$0xff]  ;;  %v237_v31 = vld [vmem:[%s2288_s17 + $0xd8] sm:$0xff]  ;;  %v234_v32 = vld [vmem:[%s2288_s17 + $0xc0] sm:$0xff] }
  0x1a   : > { %589 = vmatpush.msra.mxu2 %v231_v15  ;;  %612 = vmatpush.msra.mxu3 %v233_v16  ;;  %v236_v33 = vld [vmem:[%s2288_s17 + $0xd0] sm:$0xff]  ;;  %v247_v34 = vld [vmem:[%s2288_s17 + $0x128] sm:$0xff]  ;;  %v249_v35 = vld [vmem:[%s2288_s17 + $0x138] sm:$0xff] }
  0x1b   : > { %2070 = vmatmul.msk.f32.gmra.mxu2 %vm338_vm0, %v2323_v17  ;;  %2072 = vmatmul.msk.f32.gmra.mxu3 %vm338_vm0, %v2323_v17  ;;  %v246_v36 = vld [vmem:[%s2288_s17 + $0x120] sm:$0xff]  ;;  %v248_v37 = vld [vmem:[%s2288_s17 + $0x130] sm:$0xff]  ;;  %v243_v38 = vld [vmem:[%s2288_s17 + $0x108] sm:$0xff] }
  0x1c   : > { %452 = vmatpush.msrb.mxu0 %v218_v18  ;;  %475 = vmatpush.msrb.mxu1 %v220_v19  ;;  %v245_v39 = vld [vmem:[%s2288_s17 + $0x118] sm:$0xff]  ;;  %v242_v40 = vld [vmem:[%s2288_s17 + $0x100] sm:$0xff]  ;;  %v244_v41 = vld [vmem:[%s2288_s17 + $0x110] sm:$0xff] }
  0x1d   : > { %590 = vmatpush.msra.mxu2 %v230_v22  ;;  %613 = vmatpush.msra.mxu3 %v232_v23  ;;  %v255_v42 = vld [vmem:[%s2288_s17 + $0x168] sm:$0xff]  ;;  %v257_v43 = vld [vmem:[%s2288_s17 + $0x178] sm:$0xff]  ;;  %v254_v44 = vld [vmem:[%s2288_s17 + $0x160] sm:$0xff] }
  0x1e   : > { %543 = vmatpush.msra.mxu0 %v227_v20  ;;  %566 = vmatpush.msra.mxu1 %v229_v21  ;;  %v256_v45 = vld [vmem:[%s2288_s17 + $0x170] sm:$0xff]  ;;  %v251_v46 = vld [vmem:[%s2288_s17 + $0x148] sm:$0xff]  ;;  %v253_v47 = vld [vmem:[%s2288_s17 + $0x158] sm:$0xff] }
  0x1f   : > { %v250_v48 = vld [vmem:[%s2288_s17 + $0x140] sm:$0xff]  ;;  %v252_v49 = vld [vmem:[%s2288_s17 + $0x150] sm:$0xff]  ;;  %v263_v50 = vld [vmem:[%s2288_s17 + $0x1a8] sm:$0xff] }
  0x20   : > { %544 = vmatpush.msra.mxu0 %v226_v24  ;;  %567 = vmatpush.msra.mxu1 %v228_v25  ;;  %v265_v51 = vld [vmem:[%s2288_s17 + $0x1b8] sm:$0xff]  ;;  %v262_v52 = vld [vmem:[%s2288_s17 + $0x1a0] sm:$0xff]  ;;  %v264_v53 = vld [vmem:[%s2288_s17 + $0x1b0] sm:$0xff] }
  0x21   : > { %2066 = vmatmul.msk.f32.gmra.mxu0 %vm338_vm0, %v2323_v17  ;;  %2068 = vmatmul.msk.f32.gmra.mxu1 %vm338_vm0, %v2323_v17  ;;  %v259_v54 = vld [vmem:[%s2288_s17 + $0x188] sm:$0xff]  ;;  %v261_v55 = vld [vmem:[%s2288_s17 + $0x198] sm:$0xff]  ;;  %v258_v56 = vld [vmem:[%s2288_s17 + $0x180] sm:$0xff] }
  0x22   : > { %v260_v57 = vld [vmem:[%s2288_s17 + $0x190] sm:$0xff]  ;;  %v271_v58 = vld [vmem:[%s2288_s17 + $0x1e8] sm:$0xff]  ;;  %v273_v59 = vld [vmem:[%s2288_s17 + $0x1f8] sm:$0xff] }
  0x23   : > { %2077 = vmatmul.msk.f32.vlgmr.msrb.gmra.mxu2 %vm338_vm0, %v2300_v4  ;;  %2079 = vmatmul.msk.f32.vlgmr.msrb.gmra.mxu3 %vm338_vm0, %v2300_v4  ;;  %v270_v60 = vld [vmem:[%s2288_s17 + $0x1e0] sm:$0xff]  ;;  %v272_v61 = vld [vmem:[%s2288_s17 + $0x1f0] sm:$0xff]  ;;  %v267_v62 = vld [vmem:[%s2288_s17 + $0x1c8] sm:$0xff] }
  0x24   : > { %681 = vmatpush.msrb.mxu2 %v239_v26  ;;  %704 = vmatpush.msrb.mxu3 %v241_v27  ;;  %v269_v63 = vld [vmem:[%s2288_s17 + $0x1d8] sm:$0xff]  ;;  %v266_v0 = vld [vmem:[%s2288_s17 + $0x1c0] sm:$0xff]  ;;  %v268_v1 = vld [vmem:[%s2288_s17 + $0x1d0] sm:$0xff] }
  0x25   : > { %v279_v2 = vld [vmem:[%s2288_s17 + $0x228] sm:$0xff]  ;;  %v281_v3 = vld [vmem:[%s2288_s17 + $0x238] sm:$0xff]  ;;  %v278_v5 = vld [vmem:[%s2288_s17 + $0x220] sm:$0xff] }
  0x26   : > { %682 = vmatpush.msrb.mxu2 %v238_v28  ;;  %705 = vmatpush.msrb.mxu3 %v240_v29  ;;  %v280_v6 = vld [vmem:[%s2288_s17 + $0x230] sm:$0xff]  ;;  %v275_v7 = vld [vmem:[%s2288_s17 + $0x208] sm:$0xff]  ;;  %v277_v8 = vld [vmem:[%s2288_s17 + $0x218] sm:$0xff] }
  0x27   : > { %v274_v9 = vld [vmem:[%s2288_s17 + $0x200] sm:$0xff]  ;;  %v276_v10 = vld [vmem:[%s2288_s17 + $0x210] sm:$0xff]  ;;  %v287_v11 = vld [vmem:[%s2288_s17 + $0x268] sm:$0xff] }
  0x28   : > { %v289_v12 = vld [vmem:[%s2288_s17 + $0x278] sm:$0xff]  ;;  %v286_v13 = vld [vmem:[%s2288_s17 + $0x260] sm:$0xff]  ;;  %v288_v14 = vld [vmem:[%s2288_s17 + $0x270] sm:$0xff] }
  0x29   : > { %2073 = vmatmul.msk.f32.vlgmr.msrb.gmra.mxu0 %vm338_vm0, %v2300_v4  ;;  %2075 = vmatmul.msk.f32.vlgmr.msrb.gmra.mxu1 %vm338_vm0, %v2300_v4  ;;  %v283_v15 = vld [vmem:[%s2288_s17 + $0x248] sm:$0xff]  ;;  %v285_v16 = vld [vmem:[%s2288_s17 + $0x258] sm:$0xff]  ;;  %v282_v18 = vld [vmem:[%s2288_s17 + $0x240] sm:$0xff] }
  0x2a   : > { %635 = vmatpush.msrb.mxu0 %v235_v30  ;;  %658 = vmatpush.msrb.mxu1 %v237_v31  ;;  %v284_v19 = vld [vmem:[%s2288_s17 + $0x250] sm:$0xff]  ;;  %v295_v20 = vld [vmem:[%s2288_s17 + $0x2a8] sm:$0xff]  ;;  %v297_v21 = vld [vmem:[%s2288_s17 + $0x2b8] sm:$0xff] }
  0x2b   : > { %2078 = vmatmul.msk.f32.gmra.mxu2 %vm338_vm0, %v2323_v17  ;;  %2080 = vmatmul.msk.f32.gmra.mxu3 %vm338_vm0, %v2323_v17  ;;  %v294_v22 = vld [vmem:[%s2288_s17 + $0x2a0] sm:$0xff]  ;;  %v296_v23 = vld [vmem:[%s2288_s17 + $0x2b0] sm:$0xff]  ;;  %v291_v28 = vld [vmem:[%s2288_s17 + $0x288] sm:$0xff] }
  0x2c   : > { %636 = vmatpush.msrb.mxu0 %v234_v32  ;;  %659 = vmatpush.msrb.mxu1 %v236_v33  ;;  %v293_v29 = vld [vmem:[%s2288_s17 + $0x298] sm:$0xff]  ;;  %v290_v30 = vld [vmem:[%s2288_s17 + $0x280] sm:$0xff]  ;;  %v292_v31 = vld [vmem:[%s2288_s17 + $0x290] sm:$0xff] }
  0x31   : > { %2074 = vmatmul.msk.f32.gmra.mxu0 %vm338_vm0, %v2323_v17  ;;  %2076 = vmatmul.msk.f32.gmra.mxu1 %vm338_vm0, %v2323_v17 }
  0x33   : > { %2085 = vmatmul.msk.f32.vlgmr.msra.gmra.mxu2 %vm338_vm0, %v2300_v4  ;;  %2087 = vmatmul.msk.f32.vlgmr.msra.gmra.mxu3 %vm338_vm0, %v2300_v4 }
  0x34   : > { %773 = vmatpush.msra.mxu2 %v247_v34  ;;  %796 = vmatpush.msra.mxu3 %v249_v35 }
  0x36   : > { %774 = vmatpush.msra.mxu2 %v246_v36  ;;  %797 = vmatpush.msra.mxu3 %v248_v37  ;;  %v303_v36 = vld [vmem:[%s2288_s17 + $0x2e8] sm:$0xff]  ;;  %v305_v37 = vld [vmem:[%s2288_s17 + $0x2f8] sm:$0xff] }
  0x39   : > { %2081 = vmatmul.msk.f32.vlgmr.msra.gmra.mxu0 %vm338_vm0, %v2300_v4  ;;  %2083 = vmatmul.msk.f32.vlgmr.msra.gmra.mxu1 %vm338_vm0, %v2300_v4 }
  0x3a   : > { %727 = vmatpush.msra.mxu0 %v243_v38  ;;  %750 = vmatpush.msra.mxu1 %v245_v39  ;;  %v302_v38 = vld [vmem:[%s2288_s17 + $0x2e0] sm:$0xff]  ;;  %v304_v39 = vld [vmem:[%s2288_s17 + $0x2f0] sm:$0xff] }
  0x3b   : > { %2086 = vmatmul.msk.f32.gmra.mxu2 %vm338_vm0, %v2323_v17  ;;  %2088 = vmatmul.msk.f32.gmra.mxu3 %vm338_vm0, %v2323_v17 }
  0x3c   : > { %728 = vmatpush.msra.mxu0 %v242_v40  ;;  %751 = vmatpush.msra.mxu1 %v244_v41 }
  0x41   : > { %2082 = vmatmul.msk.f32.gmra.mxu0 %vm338_vm0, %v2323_v17  ;;  %2084 = vmatmul.msk.f32.gmra.mxu1 %vm338_vm0, %v2323_v17 }
  0x43   : > { %2093 = vmatmul.msk.f32.vlgmr.msrb.gmra.mxu2 %vm338_vm0, %v2300_v4  ;;  %2095 = vmatmul.msk.f32.vlgmr.msrb.gmra.mxu3 %vm338_vm0, %v2300_v4 }
  0x44   : > { %865 = vmatpush.msrb.mxu2 %v255_v42  ;;  %888 = vmatpush.msrb.mxu3 %v257_v43 }
  0x46   : > { %866 = vmatpush.msrb.mxu2 %v254_v44  ;;  %889 = vmatpush.msrb.mxu3 %v256_v45  ;;  %v299_v44 = vld [vmem:[%s2288_s17 + $0x2c8] sm:$0xff]  ;;  %v301_v45 = vld [vmem:[%s2288_s17 + $0x2d8] sm:$0xff] }
  0x49   : > { %2089 = vmatmul.msk.f32.vlgmr.msrb.gmra.mxu0 %vm338_vm0, %v2300_v4  ;;  %2091 = vmatmul.msk.f32.vlgmr.msrb.gmra.mxu1 %vm338_vm0, %v2300_v4 }
  0x4a   : > { %819 = vmatpush.msrb.mxu0 %v251_v46  ;;  %842 = vmatpush.msrb.mxu1 %v253_v47  ;;  %v298_v46 = vld [vmem:[%s2288_s17 + $0x2c0] sm:$0xff]  ;;  %v300_v47 = vld [vmem:[%s2288_s17 + $0x2d0] sm:$0xff] }
  0x4b   : > { %2094 = vmatmul.msk.f32.gmra.mxu2 %vm338_vm0, %v2323_v17  ;;  %2096 = vmatmul.msk.f32.gmra.mxu3 %vm338_vm0, %v2323_v17 }
  0x4c   : > { %820 = vmatpush.msrb.mxu0 %v250_v48  ;;  %843 = vmatpush.msrb.mxu1 %v252_v49 }
  0x51   : > { %2090 = vmatmul.msk.f32.gmra.mxu0 %vm338_vm0, %v2323_v17  ;;  %2092 = vmatmul.msk.f32.gmra.mxu1 %vm338_vm0, %v2323_v17 }
  0x53   : > { %2101 = vmatmul.msk.f32.vlgmr.msra.gmra.mxu2 %vm338_vm0, %v2300_v4  ;;  %2103 = vmatmul.msk.f32.vlgmr.msra.gmra.mxu3 %vm338_vm0, %v2300_v4 }
  0x54   : > { %957 = vmatpush.msra.mxu2 %v263_v50  ;;  %980 = vmatpush.msra.mxu3 %v265_v51 }
  0x56   : > { %958 = vmatpush.msra.mxu2 %v262_v52  ;;  %981 = vmatpush.msra.mxu3 %v264_v53  ;;  %v311_v52 = vld [vmem:[%s2288_s17 + $0x328] sm:$0xff]  ;;  %v313_v53 = vld [vmem:[%s2288_s17 + $0x338] sm:$0xff] }
  0x59   : > { %2097 = vmatmul.msk.f32.vlgmr.msra.gmra.mxu0 %vm338_vm0, %v2300_v4  ;;  %2099 = vmatmul.msk.f32.vlgmr.msra.gmra.mxu1 %vm338_vm0, %v2300_v4 }
  0x5a   : > { %911 = vmatpush.msra.mxu0 %v259_v54  ;;  %934 = vmatpush.msra.mxu1 %v261_v55  ;;  %v310_v54 = vld [vmem:[%s2288_s17 + $0x320] sm:$0xff]  ;;  %v312_v55 = vld [vmem:[%s2288_s17 + $0x330] sm:$0xff] }
  0x5b   : > { %2102 = vmatmul.msk.f32.gmra.mxu2 %vm338_vm0, %v2323_v17  ;;  %2104 = vmatmul.msk.f32.gmra.mxu3 %vm338_vm0, %v2323_v17 }
  0x5c   : > { %912 = vmatpush.msra.mxu0 %v258_v56  ;;  %935 = vmatpush.msra.mxu1 %v260_v57 }
  0x61   : > { %2098 = vmatmul.msk.f32.gmra.mxu0 %vm338_vm0, %v2323_v17  ;;  %2100 = vmatmul.msk.f32.gmra.mxu1 %vm338_vm0, %v2323_v17 }
  0x63   : > { %2109 = vmatmul.msk.f32.vlgmr.msrb.gmra.mxu2 %vm338_vm0, %v2300_v4  ;;  %2111 = vmatmul.msk.f32.vlgmr.msrb.gmra.mxu3 %vm338_vm0, %v2300_v4 }
  0x64   : > { %1049 = vmatpush.msrb.mxu2 %v271_v58  ;;  %1072 = vmatpush.msrb.mxu3 %v273_v59 }
  0x66   : > { %1050 = vmatpush.msrb.mxu2 %v270_v60  ;;  %1073 = vmatpush.msrb.mxu3 %v272_v61  ;;  %v307_v60 = vld [vmem:[%s2288_s17 + $0x308] sm:$0xff]  ;;  %v309_v61 = vld [vmem:[%s2288_s17 + $0x318] sm:$0xff] }
  0x69   : > { %2105 = vmatmul.msk.f32.vlgmr.msrb.gmra.mxu0 %vm338_vm0, %v2300_v4  ;;  %2107 = vmatmul.msk.f32.vlgmr.msrb.gmra.mxu1 %vm338_vm0, %v2300_v4 }
  0x6a   : > { %1003 = vmatpush.msrb.mxu0 %v267_v62  ;;  %1026 = vmatpush.msrb.mxu1 %v269_v63  ;;  %v306_v62 = vld [vmem:[%s2288_s17 + $0x300] sm:$0xff]  ;;  %v308_v63 = vld [vmem:[%s2288_s17 + $0x310] sm:$0xff] }
  0x6b   : > { %2110 = vmatmul.msk.f32.gmra.mxu2 %vm338_vm0, %v2323_v17  ;;  %2112 = vmatmul.msk.f32.gmra.mxu3 %vm338_vm0, %v2323_v17 }
  0x6c   : > { %1004 = vmatpush.msrb.mxu0 %v266_v0  ;;  %1027 = vmatpush.msrb.mxu1 %v268_v1 }
  0x71   : > { %2106 = vmatmul.msk.f32.gmra.mxu0 %vm338_vm0, %v2323_v17  ;;  %2108 = vmatmul.msk.f32.gmra.mxu1 %vm338_vm0, %v2323_v17 }
  0x73   : > { %2117 = vmatmul.msk.f32.vlgmr.msra.gmra.mxu2 %vm338_vm0, %v2300_v4  ;;  %2119 = vmatmul.msk.f32.vlgmr.msra.gmra.mxu3 %vm338_vm0, %v2300_v4 }
  0x74   : > { %1141 = vmatpush.msra.mxu2 %v279_v2  ;;  %1164 = vmatpush.msra.mxu3 %v281_v3 }
  0x76   : > { %1142 = vmatpush.msra.mxu2 %v278_v5  ;;  %1165 = vmatpush.msra.mxu3 %v280_v6  ;;  %v319_v5 = vld [vmem:[%s2288_s17 + $0x368] sm:$0xff]  ;;  %v321_v6 = vld [vmem:[%s2288_s17 + $0x378] sm:$0xff] }
  0x79   : > { %2113 = vmatmul.msk.f32.vlgmr.msra.gmra.mxu0 %vm338_vm0, %v2300_v4  ;;  %2115 = vmatmul.msk.f32.vlgmr.msra.gmra.mxu1 %vm338_vm0, %v2300_v4 }
  0x7a   : > { %1095 = vmatpush.msra.mxu0 %v275_v7  ;;  %1118 = vmatpush.msra.mxu1 %v277_v8  ;;  %v318_v7 = vld [vmem:[%s2288_s17 + $0x360] sm:$0xff]  ;;  %v320_v8 = vld [vmem:[%s2288_s17 + $0x370] sm:$0xff] }
  0x7b   : > { %2118 = vmatmul.msk.f32.gmra.mxu2 %vm338_vm0, %v2323_v17  ;;  %2120 = vmatmul.msk.f32.gmra.mxu3 %vm338_vm0, %v2323_v17 }
  0x7c   : > { %1096 = vmatpush.msra.mxu0 %v274_v9  ;;  %1119 = vmatpush.msra.mxu1 %v276_v10 }
  0x81   : > { %2114 = vmatmul.msk.f32.gmra.mxu0 %vm338_vm0, %v2323_v17  ;;  %2116 = vmatmul.msk.f32.gmra.mxu1 %vm338_vm0, %v2323_v17 }
  0x83   : > { %2125 = vmatmul.msk.f32.vlgmr.msrb.gmra.mxu2 %vm338_vm0, %v2300_v4  ;;  %2127 = vmatmul.msk.f32.vlgmr.msrb.gmra.mxu3 %vm338_vm0, %v2300_v4 }
  0x84   : > { %1233 = vmatpush.msrb.mxu2 %v287_v11  ;;  %1256 = vmatpush.msrb.mxu3 %v289_v12 }
  0x86   : > { %1234 = vmatpush.msrb.mxu2 %v286_v13  ;;  %1257 = vmatpush.msrb.mxu3 %v288_v14  ;;  %v315_v13 = vld [vmem:[%s2288_s17 + $0x348] sm:$0xff]  ;;  %v317_v14 = vld [vmem:[%s2288_s17 + $0x358] sm:$0xff] }
  0x89   : > { %2121 = vmatmul.msk.f32.vlgmr.msrb.gmra.mxu0 %vm338_vm0, %v2300_v4  ;;  %2123 = vmatmul.msk.f32.vlgmr.msrb.gmra.mxu1 %vm338_vm0, %v2300_v4 }
  0x8a   : > { %1187 = vmatpush.msrb.mxu0 %v283_v15  ;;  %1210 = vmatpush.msrb.mxu1 %v285_v16  ;;  %v314_v15 = vld [vmem:[%s2288_s17 + $0x340] sm:$0xff]  ;;  %v316_v16 = vld [vmem:[%s2288_s17 + $0x350] sm:$0xff] }
  0x8b   : > { %2126 = vmatmul.msk.f32.gmra.mxu2 %vm338_vm0, %v2323_v17  ;;  %2128 = vmatmul.msk.f32.gmra.mxu3 %vm338_vm0, %v2323_v17 }
  0x8c   : > { %1188 = vmatpush.msrb.mxu0 %v282_v18  ;;  %1211 = vmatpush.msrb.mxu1 %v284_v19 }
  0x91   : > { %2122 = vmatmul.msk.f32.gmra.mxu0 %vm338_vm0, %v2323_v17  ;;  %2124 = vmatmul.msk.f32.gmra.mxu1 %vm338_vm0, %v2323_v17 }
  0x93   : > { %2133 = vmatmul.msk.f32.vlgmr.msra.gmra.mxu2 %vm338_vm0, %v2300_v4  ;;  %2135 = vmatmul.msk.f32.vlgmr.msra.gmra.mxu3 %vm338_vm0, %v2300_v4 }
  0x94   : > { %1325 = vmatpush.msra.mxu2 %v295_v20  ;;  %1348 = vmatpush.msra.mxu3 %v297_v21 }
  0x95   : > { %v362_v24 = vpop.f32.mrf.mxu0  ;;  %v385_v25 = vpop.f32.mrf.mxu1 }
  0x96   : > { %1818 = vst.msk [vmem:[%s2520_s23] sm:$0xff] %vm1817_vm1, %v362_v24  ;;  %v408_v26 = vpop.f32.mrf.mxu2  ;;  %v431_v27 = vpop.f32.mrf.mxu3  ;;  %1326 = vmatpush.msra.mxu2 %v294_v22  ;;  %1349 = vmatpush.msra.mxu3 %v296_v23  ;;  %v327_v22 = vld [vmem:[%s2288_s17 + $0x3a8] sm:$0xff]  ;;  %v329_v23 = vld [vmem:[%s2288_s17 + $0x3b8] sm:$0xff]  ;;  %v326_v24 = vld [vmem:[%s2288_s17 + $0x3a0] sm:$0xff] }
  0x97   : > { %1820 = vst.msk [vmem:[%s2520_s23 + $0x10] sm:$0xff] %vm1817_vm1, %v385_v25  ;;  %v328_v25 = vld [vmem:[%s2288_s17 + $0x3b0] sm:$0xff] }
  0x98   : > { %1822 = vst.msk [vmem:[%s2520_s23 + $0x20] sm:$0xff] %vm1817_vm1, %v408_v26 }
  0x99   : > { %2129 = vmatmul.msk.f32.vlgmr.msra.gmra.mxu0 %vm338_vm0, %v2300_v4  ;;  %2131 = vmatmul.msk.f32.vlgmr.msra.gmra.mxu1 %vm338_vm0, %v2300_v4  ;;  %1824 = vst.msk [vmem:[%s2520_s23 + $0x30] sm:$0xff] %vm1817_vm1, %v431_v27 }
  0x9a   : > { %1279 = vmatpush.msra.mxu0 %v291_v28  ;;  %1302 = vmatpush.msra.mxu1 %v293_v29 }
  0x9b   : > { %2134 = vmatmul.msk.f32.gmra.mxu2 %vm338_vm0, %v2323_v17  ;;  %2136 = vmatmul.msk.f32.gmra.mxu3 %vm338_vm0, %v2323_v17 }
  0x9c   : > { %1280 = vmatpush.msra.mxu0 %v290_v30  ;;  %1303 = vmatpush.msra.mxu1 %v292_v31  ;;  %v323_v30 = vld [vmem:[%s2288_s17 + $0x388] sm:$0xff]  ;;  %v325_v31 = vld [vmem:[%s2288_s17 + $0x398] sm:$0xff] }
  0x9e   : > { %v365_v32 = vpop.f32.mrf.mxu0  ;;  %v388_v33 = vpop.f32.mrf.mxu1 }
  0x9f   : > { %1819 = vst.msk [vmem:[%s2520_s23 + $0x8] sm:$0xff] %vm1817_vm1, %v365_v32  ;;  %v411_v34 = vpop.f32.mrf.mxu2  ;;  %v434_v35 = vpop.f32.mrf.mxu3  ;;  %v322_v32 = vld [vmem:[%s2288_s17 + $0x380] sm:$0xff] }
  0xa0   : > { %1821 = vst.msk [vmem:[%s2520_s23 + $0x18] sm:$0xff] %vm1817_vm1, %v388_v33  ;;  %v324_v33 = vld [vmem:[%s2288_s17 + $0x390] sm:$0xff] }
  0xa1   : > { %1823 = vst.msk [vmem:[%s2520_s23 + $0x28] sm:$0xff] %vm1817_vm1, %v411_v34  ;;  %2130 = vmatmul.msk.f32.gmra.mxu0 %vm338_vm0, %v2323_v17  ;;  %2132 = vmatmul.msk.f32.gmra.mxu1 %vm338_vm0, %v2323_v17 }
  0xa2   : > { %1825 = vst.msk [vmem:[%s2520_s23 + $0x38] sm:$0xff] %vm1817_vm1, %v434_v35 }
  0xa3   : > { %2141 = vmatmul.msk.f32.vlgmr.msrb.gmra.mxu2 %vm338_vm0, %v2300_v4  ;;  %2143 = vmatmul.msk.f32.vlgmr.msrb.gmra.mxu3 %vm338_vm0, %v2300_v4 }
  0xa4   : > { %1417 = vmatpush.msrb.mxu2 %v303_v36  ;;  %1440 = vmatpush.msrb.mxu3 %v305_v37 }
  0xa6   : > { %v454_v40 = vpop.f32.mrf.mxu0  ;;  %v477_v41 = vpop.f32.mrf.mxu1  ;;  %1418 = vmatpush.msrb.mxu2 %v302_v38  ;;  %1441 = vmatpush.msrb.mxu3 %v304_v39  ;;  %v335_v38 = vld [vmem:[%s2288_s17 + $0x3e8] sm:$0xff]  ;;  %v337_v39 = vld [vmem:[%s2288_s17 + $0x3f8] sm:$0xff] }
  0xa7   : > { %1826 = vst.msk [vmem:[%s2520_s23 + $0x40] sm:$0xff] %vm1817_vm1, %v454_v40  ;;  %v500_v42 = vpop.f32.mrf.mxu2  ;;  %v523_v43 = vpop.f32.mrf.mxu3  ;;  %v334_v40 = vld [vmem:[%s2288_s17 + $0x3e0] sm:$0xff] }
  0xa8   : > { %1828 = vst.msk [vmem:[%s2520_s23 + $0x50] sm:$0xff] %vm1817_vm1, %v477_v41  ;;  %v336_v41 = vld [vmem:[%s2288_s17 + $0x3f0] sm:$0xff] }
  0xa9   : > { %1830 = vst.msk [vmem:[%s2520_s23 + $0x60] sm:$0xff] %vm1817_vm1, %v500_v42  ;;  %2137 = vmatmul.msk.f32.vlgmr.msrb.gmra.mxu0 %vm338_vm0, %v2300_v4  ;;  %2139 = vmatmul.msk.f32.vlgmr.msrb.gmra.mxu1 %vm338_vm0, %v2300_v4 }
  0xaa   : > { %1832 = vst.msk [vmem:[%s2520_s23 + $0x70] sm:$0xff] %vm1817_vm1, %v523_v43  ;;  %1371 = vmatpush.msrb.mxu0 %v299_v44  ;;  %1394 = vmatpush.msrb.mxu1 %v301_v45 }
  0xab   : > { %2142 = vmatmul.msk.f32.gmra.mxu2 %vm338_vm0, %v2323_v17  ;;  %2144 = vmatmul.msk.f32.gmra.mxu3 %vm338_vm0, %v2323_v17 }
  0xac   : > { %1372 = vmatpush.msrb.mxu0 %v298_v46  ;;  %1395 = vmatpush.msrb.mxu1 %v300_v47  ;;  %v331_v46 = vld [vmem:[%s2288_s17 + $0x3c8] sm:$0xff]  ;;  %v333_v47 = vld [vmem:[%s2288_s17 + $0x3d8] sm:$0xff] }
  0xae   : > { %v457_v48 = vpop.f32.mrf.mxu0  ;;  %v480_v49 = vpop.f32.mrf.mxu1 }
  0xaf   : > { %1827 = vst.msk [vmem:[%s2520_s23 + $0x48] sm:$0xff] %vm1817_vm1, %v457_v48  ;;  %v503_v50 = vpop.f32.mrf.mxu2  ;;  %v526_v51 = vpop.f32.mrf.mxu3  ;;  %v330_v48 = vld [vmem:[%s2288_s17 + $0x3c0] sm:$0xff] }
  0xb0   : > { %1829 = vst.msk [vmem:[%s2520_s23 + $0x58] sm:$0xff] %vm1817_vm1, %v480_v49  ;;  %v332_v49 = vld [vmem:[%s2288_s17 + $0x3d0] sm:$0xff] }
  0xb1   : > { %1831 = vst.msk [vmem:[%s2520_s23 + $0x68] sm:$0xff] %vm1817_vm1, %v503_v50  ;;  %2138 = vmatmul.msk.f32.gmra.mxu0 %vm338_vm0, %v2323_v17  ;;  %2140 = vmatmul.msk.f32.gmra.mxu1 %vm338_vm0, %v2323_v17 }
  0xb2   : > { %1833 = vst.msk [vmem:[%s2520_s23 + $0x78] sm:$0xff] %vm1817_vm1, %v526_v51 }
  0xb3   : > { %2149 = vmatmul.msk.f32.vlgmr.msra.gmra.mxu2 %vm338_vm0, %v2300_v4  ;;  %2151 = vmatmul.msk.f32.vlgmr.msra.gmra.mxu3 %vm338_vm0, %v2300_v4 }
  0xb4   : > { %1509 = vmatpush.msra.mxu2 %v311_v52  ;;  %1532 = vmatpush.msra.mxu3 %v313_v53 }
  0xb6   : > { %v546_v56 = vpop.f32.mrf.mxu0  ;;  %v569_v57 = vpop.f32.mrf.mxu1  ;;  %1510 = vmatpush.msra.mxu2 %v310_v54  ;;  %1533 = vmatpush.msra.mxu3 %v312_v55 }
  0xb7   : > { %1834 = vst.msk [vmem:[%s2520_s23 + $0x80] sm:$0xff] %vm1817_vm1, %v546_v56  ;;  %v592_v58 = vpop.f32.mrf.mxu2  ;;  %v615_v59 = vpop.f32.mrf.mxu3 }
  0xb8   : > { %1836 = vst.msk [vmem:[%s2520_s23 + $0x90] sm:$0xff] %vm1817_vm1, %v569_v57 }
  0xb9   : > { %1838 = vst.msk [vmem:[%s2520_s23 + $0xa0] sm:$0xff] %vm1817_vm1, %v592_v58  ;;  %2145 = vmatmul.msk.f32.vlgmr.msra.gmra.mxu0 %vm338_vm0, %v2300_v4  ;;  %2147 = vmatmul.msk.f32.vlgmr.msra.gmra.mxu1 %vm338_vm0, %v2300_v4 }
  0xba   : > { %1840 = vst.msk [vmem:[%s2520_s23 + $0xb0] sm:$0xff] %vm1817_vm1, %v615_v59  ;;  %1463 = vmatpush.msra.mxu0 %v307_v60  ;;  %1486 = vmatpush.msra.mxu1 %v309_v61 }
  0xbb   : > { %2150 = vmatmul.msk.f32.gmra.mxu2 %vm338_vm0, %v2323_v17  ;;  %2152 = vmatmul.msk.f32.gmra.mxu3 %vm338_vm0, %v2323_v17 }
  0xbc   : > { %1464 = vmatpush.msra.mxu0 %v306_v62  ;;  %1487 = vmatpush.msra.mxu1 %v308_v63 }
  0xbe   : > { %v549_v0 = vpop.f32.mrf.mxu0  ;;  %v572_v1 = vpop.f32.mrf.mxu1 }
  0xbf   : > { %1835 = vst.msk [vmem:[%s2520_s23 + $0x88] sm:$0xff] %vm1817_vm1, %v549_v0  ;;  %v595_v2 = vpop.f32.mrf.mxu2  ;;  %v618_v3 = vpop.f32.mrf.mxu3 }
  0xc0   : > { %1837 = vst.msk [vmem:[%s2520_s23 + $0x98] sm:$0xff] %vm1817_vm1, %v572_v1 }
  0xc1   : > { %1839 = vst.msk [vmem:[%s2520_s23 + $0xa8] sm:$0xff] %vm1817_vm1, %v595_v2  ;;  %2146 = vmatmul.msk.f32.gmra.mxu0 %vm338_vm0, %v2323_v17  ;;  %2148 = vmatmul.msk.f32.gmra.mxu1 %vm338_vm0, %v2323_v17 }
  0xc2   : > { %1841 = vst.msk [vmem:[%s2520_s23 + $0xb8] sm:$0xff] %vm1817_vm1, %v618_v3 }
  0xc3   : > { %2157 = vmatmul.msk.f32.vlgmr.msrb.gmra.mxu2 %vm338_vm0, %v2300_v4  ;;  %2159 = vmatmul.msk.f32.vlgmr.msrb.gmra.mxu3 %vm338_vm0, %v2300_v4 }
  0xc4   : > { %1601 = vmatpush.msrb.mxu2 %v319_v5  ;;  %1624 = vmatpush.msrb.mxu3 %v321_v6 }
  0xc6   : > { %v638_v9 = vpop.f32.mrf.mxu0  ;;  %v661_v10 = vpop.f32.mrf.mxu1  ;;  %1602 = vmatpush.msrb.mxu2 %v318_v7  ;;  %1625 = vmatpush.msrb.mxu3 %v320_v8 }
  0xc7   : > { %1842 = vst.msk [vmem:[%s2520_s23 + $0xc0] sm:$0xff] %vm1817_vm1, %v638_v9  ;;  %v684_v11 = vpop.f32.mrf.mxu2  ;;  %v707_v12 = vpop.f32.mrf.mxu3 }
  0xc8   : > { %1844 = vst.msk [vmem:[%s2520_s23 + $0xd0] sm:$0xff] %vm1817_vm1, %v661_v10 }
  0xc9   : > { %1846 = vst.msk [vmem:[%s2520_s23 + $0xe0] sm:$0xff] %vm1817_vm1, %v684_v11  ;;  %2153 = vmatmul.msk.f32.vlgmr.msrb.gmra.mxu0 %vm338_vm0, %v2300_v4  ;;  %2155 = vmatmul.msk.f32.vlgmr.msrb.gmra.mxu1 %vm338_vm0, %v2300_v4 }
  0xca   : > { %1848 = vst.msk [vmem:[%s2520_s23 + $0xf0] sm:$0xff] %vm1817_vm1, %v707_v12  ;;  %1555 = vmatpush.msrb.mxu0 %v315_v13  ;;  %1578 = vmatpush.msrb.mxu1 %v317_v14 }
  0xcb   : > { %2158 = vmatmul.msk.f32.gmra.mxu2 %vm338_vm0, %v2323_v17  ;;  %2160 = vmatmul.msk.f32.gmra.mxu3 %vm338_vm0, %v2323_v17 }
  0xcc   : > { %1556 = vmatpush.msrb.mxu0 %v314_v15  ;;  %1579 = vmatpush.msrb.mxu1 %v316_v16 }
  0xce   : > { %v641_v18 = vpop.f32.mrf.mxu0  ;;  %v664_v19 = vpop.f32.mrf.mxu1 }
  0xcf   : > { %1843 = vst.msk [vmem:[%s2520_s23 + $0xc8] sm:$0xff] %vm1817_vm1, %v641_v18  ;;  %v687_v20 = vpop.f32.mrf.mxu2  ;;  %v710_v21 = vpop.f32.mrf.mxu3 }
  0xd0   : > { %1845 = vst.msk [vmem:[%s2520_s23 + $0xd8] sm:$0xff] %vm1817_vm1, %v664_v19 }
  0xd1   : > { %1847 = vst.msk [vmem:[%s2520_s23 + $0xe8] sm:$0xff] %vm1817_vm1, %v687_v20  ;;  %2154 = vmatmul.msk.f32.gmra.mxu0 %vm338_vm0, %v2323_v17  ;;  %2156 = vmatmul.msk.f32.gmra.mxu1 %vm338_vm0, %v2323_v17 }
  0xd2   : > { %1849 = vst.msk [vmem:[%s2520_s23 + $0xf8] sm:$0xff] %vm1817_vm1, %v710_v21 }
  0xd3   : > { %2165 = vmatmul.msk.f32.vlgmr.msra.gmra.mxu2 %vm338_vm0, %v2300_v4  ;;  %2167 = vmatmul.msk.f32.vlgmr.msra.gmra.mxu3 %vm338_vm0, %v2300_v4 }
  0xd4   : > { %1693 = vmatpush.msra.mxu2 %v327_v22  ;;  %1716 = vmatpush.msra.mxu3 %v329_v23 }
  0xd6   : > { %v730_v26 = vpop.f32.mrf.mxu0  ;;  %v753_v27 = vpop.f32.mrf.mxu1  ;;  %1694 = vmatpush.msra.mxu2 %v326_v24  ;;  %1717 = vmatpush.msra.mxu3 %v328_v25 }
  0xd7   : > { %1850 = vst.msk [vmem:[%s2520_s23 + $0x100] sm:$0xff] %vm1817_vm1, %v730_v26  ;;  %v776_v28 = vpop.f32.mrf.mxu2  ;;  %v799_v29 = vpop.f32.mrf.mxu3 }
  0xd8   : > { %1852 = vst.msk [vmem:[%s2520_s23 + $0x110] sm:$0xff] %vm1817_vm1, %v753_v27 }
  0xd9   : > { %1854 = vst.msk [vmem:[%s2520_s23 + $0x120] sm:$0xff] %vm1817_vm1, %v776_v28  ;;  %2161 = vmatmul.msk.f32.vlgmr.msra.gmra.mxu0 %vm338_vm0, %v2300_v4  ;;  %2163 = vmatmul.msk.f32.vlgmr.msra.gmra.mxu1 %vm338_vm0, %v2300_v4 }
  0xda   : > { %1856 = vst.msk [vmem:[%s2520_s23 + $0x130] sm:$0xff] %vm1817_vm1, %v799_v29  ;;  %1647 = vmatpush.msra.mxu0 %v323_v30  ;;  %1670 = vmatpush.msra.mxu1 %v325_v31 }
  0xdb   : > { %2166 = vmatmul.msk.f32.gmra.mxu2 %vm338_vm0, %v2323_v17  ;;  %2168 = vmatmul.msk.f32.gmra.mxu3 %vm338_vm0, %v2323_v17 }
  0xdc   : > { %1648 = vmatpush.msra.mxu0 %v322_v32  ;;  %1671 = vmatpush.msra.mxu1 %v324_v33 }
  0xde   : > { %v733_v34 = vpop.f32.mrf.mxu0  ;;  %v756_v35 = vpop.f32.mrf.mxu1 }
  0xdf   : > { %1851 = vst.msk [vmem:[%s2520_s23 + $0x108] sm:$0xff] %vm1817_vm1, %v733_v34  ;;  %v779_v36 = vpop.f32.mrf.mxu2  ;;  %v802_v37 = vpop.f32.mrf.mxu3 }
  0xe0   : > { %1853 = vst.msk [vmem:[%s2520_s23 + $0x118] sm:$0xff] %vm1817_vm1, %v756_v35 }
  0xe1   : > { %1855 = vst.msk [vmem:[%s2520_s23 + $0x128] sm:$0xff] %vm1817_vm1, %v779_v36  ;;  %2162 = vmatmul.msk.f32.gmra.mxu0 %vm338_vm0, %v2323_v17  ;;  %2164 = vmatmul.msk.f32.gmra.mxu1 %vm338_vm0, %v2323_v17 }
  0xe2   : > { %1857 = vst.msk [vmem:[%s2520_s23 + $0x138] sm:$0xff] %vm1817_vm1, %v802_v37 }
  0xe3   : > { %2173 = vmatmul.msk.f32.vlgmr.msrb.gmra.mxu2 %vm338_vm0, %v2300_v4  ;;  %2175 = vmatmul.msk.f32.vlgmr.msrb.gmra.mxu3 %vm338_vm0, %v2300_v4 }
  0xe4   : > { %1785 = vmatpush.msrb.mxu2 %v335_v38  ;;  %1808 = vmatpush.msrb.mxu3 %v337_v39 }
  0xe6   : > { %v822_v42 = vpop.f32.mrf.mxu0  ;;  %v845_v43 = vpop.f32.mrf.mxu1  ;;  %1786 = vmatpush.msrb.mxu2 %v334_v40  ;;  %1809 = vmatpush.msrb.mxu3 %v336_v41 }
  0xe7   : > { %1858 = vst.msk [vmem:[%s2520_s23 + $0x140] sm:$0xff] %vm1817_vm1, %v822_v42  ;;  %v868_v44 = vpop.f32.mrf.mxu2  ;;  %v891_v45 = vpop.f32.mrf.mxu3 }
  0xe8   : > { %1860 = vst.msk [vmem:[%s2520_s23 + $0x150] sm:$0xff] %vm1817_vm1, %v845_v43 }
  0xe9   : > { %1862 = vst.msk [vmem:[%s2520_s23 + $0x160] sm:$0xff] %vm1817_vm1, %v868_v44  ;;  %2169 = vmatmul.msk.f32.vlgmr.msrb.gmra.mxu0 %vm338_vm0, %v2300_v4  ;;  %2171 = vmatmul.msk.f32.vlgmr.msrb.gmra.mxu1 %vm338_vm0, %v2300_v4 }
  0xea   : > { %1864 = vst.msk [vmem:[%s2520_s23 + $0x170] sm:$0xff] %vm1817_vm1, %v891_v45  ;;  %1739 = vmatpush.msrb.mxu0 %v331_v46  ;;  %1762 = vmatpush.msrb.mxu1 %v333_v47 }
  0xeb   : > { %2174 = vmatmul.msk.f32.gmra.mxu2 %vm338_vm0, %v2323_v17  ;;  %2176 = vmatmul.msk.f32.gmra.mxu3 %vm338_vm0, %v2323_v17 }
  0xec   : > { %1740 = vmatpush.msrb.mxu0 %v330_v48  ;;  %1763 = vmatpush.msrb.mxu1 %v332_v49 }
  0xee   : > { %v825_v50 = vpop.f32.mrf.mxu0  ;;  %v848_v51 = vpop.f32.mrf.mxu1 }
  0xef   : > { %1859 = vst.msk [vmem:[%s2520_s23 + $0x148] sm:$0xff] %vm1817_vm1, %v825_v50  ;;  %v871_v52 = vpop.f32.mrf.mxu2  ;;  %v894_v53 = vpop.f32.mrf.mxu3 }
  0xf0   : > { %1861 = vst.msk [vmem:[%s2520_s23 + $0x158] sm:$0xff] %vm1817_vm1, %v848_v51 }
  0xf1   : > { %1863 = vst.msk [vmem:[%s2520_s23 + $0x168] sm:$0xff] %vm1817_vm1, %v871_v52  ;;  %2170 = vmatmul.msk.f32.gmra.mxu0 %vm338_vm0, %v2323_v17  ;;  %2172 = vmatmul.msk.f32.gmra.mxu1 %vm338_vm0, %v2323_v17 }
  0xf2   : > { %1865 = vst.msk [vmem:[%s2520_s23 + $0x178] sm:$0xff] %vm1817_vm1, %v894_v53 }
  0xf3   : > { %2181 = vmatmul.msk.f32.vlgmr.msra.gmra.mxu2 %vm338_vm0, %v2300_v4  ;;  %2183 = vmatmul.msk.f32.vlgmr.msra.gmra.mxu3 %vm338_vm0, %v2300_v4 }
  0xf6   : > { %v914_v54 = vpop.f32.mrf.mxu0  ;;  %v937_v55 = vpop.f32.mrf.mxu1 }
  0xf7   : > { %1866 = vst.msk [vmem:[%s2520_s23 + $0x180] sm:$0xff] %vm1817_vm1, %v914_v54  ;;  %v960_v56 = vpop.f32.mrf.mxu2  ;;  %v983_v57 = vpop.f32.mrf.mxu3 }
  0xf8   : > { %1868 = vst.msk [vmem:[%s2520_s23 + $0x190] sm:$0xff] %vm1817_vm1, %v937_v55 }
  0xf9   : > { %1870 = vst.msk [vmem:[%s2520_s23 + $0x1a0] sm:$0xff] %vm1817_vm1, %v960_v56  ;;  %2177 = vmatmul.msk.f32.vlgmr.msra.gmra.mxu0 %vm338_vm0, %v2300_v4  ;;  %2179 = vmatmul.msk.f32.vlgmr.msra.gmra.mxu1 %vm338_vm0, %v2300_v4 }
  0xfa   : > { %1872 = vst.msk [vmem:[%s2520_s23 + $0x1b0] sm:$0xff] %vm1817_vm1, %v983_v57 }
  0xfb   : > { %2182 = vmatmul.msk.f32.gmra.mxu2 %vm338_vm0, %v2323_v17  ;;  %2184 = vmatmul.msk.f32.gmra.mxu3 %vm338_vm0, %v2323_v17 }
  0xfe   : > { %v917_v58 = vpop.f32.mrf.mxu0  ;;  %v940_v59 = vpop.f32.mrf.mxu1 }
  0xff   : > { %1867 = vst.msk [vmem:[%s2520_s23 + $0x188] sm:$0xff] %vm1817_vm1, %v917_v58  ;;  %v963_v60 = vpop.f32.mrf.mxu2  ;;  %v986_v61 = vpop.f32.mrf.mxu3 }
 0x100   : > { %1869 = vst.msk [vmem:[%s2520_s23 + $0x198] sm:$0xff] %vm1817_vm1, %v940_v59 }
 0x101   : > { %1871 = vst.msk [vmem:[%s2520_s23 + $0x1a8] sm:$0xff] %vm1817_vm1, %v963_v60  ;;  %2178 = vmatmul.msk.f32.gmra.mxu0 %vm338_vm0, %v2323_v17  ;;  %2180 = vmatmul.msk.f32.gmra.mxu1 %vm338_vm0, %v2323_v17 }
 0x102   : > { %1873 = vst.msk [vmem:[%s2520_s23 + $0x1b8] sm:$0xff] %vm1817_vm1, %v986_v61 }
 0x103   : > { %2189 = vmatmul.msk.f32.vlgmr.msrb.gmra.mxu2 %vm338_vm0, %v2300_v4  ;;  %2191 = vmatmul.msk.f32.vlgmr.msrb.gmra.mxu3 %vm338_vm0, %v2300_v4 }
 0x106   : > { %v1006_v62 = vpop.f32.mrf.mxu0  ;;  %v1029_v63 = vpop.f32.mrf.mxu1 }
 0x107   : > { %1874 = vst.msk [vmem:[%s2520_s23 + $0x1c0] sm:$0xff] %vm1817_vm1, %v1006_v62  ;;  %v1052_v0 = vpop.f32.mrf.mxu2  ;;  %v1075_v1 = vpop.f32.mrf.mxu3 }
 0x108   : > { %1876 = vst.msk [vmem:[%s2520_s23 + $0x1d0] sm:$0xff] %vm1817_vm1, %v1029_v63 }
 0x109   : > { %1878 = vst.msk [vmem:[%s2520_s23 + $0x1e0] sm:$0xff] %vm1817_vm1, %v1052_v0  ;;  %2185 = vmatmul.msk.f32.vlgmr.msrb.gmra.mxu0 %vm338_vm0, %v2300_v4  ;;  %2187 = vmatmul.msk.f32.vlgmr.msrb.gmra.mxu1 %vm338_vm0, %v2300_v4 }
 0x10a   : > { %1880 = vst.msk [vmem:[%s2520_s23 + $0x1f0] sm:$0xff] %vm1817_vm1, %v1075_v1 }
 0x10b   : > { %2190 = vmatmul.msk.f32.gmra.mxu2 %vm338_vm0, %v2323_v17  ;;  %2192 = vmatmul.msk.f32.gmra.mxu3 %vm338_vm0, %v2323_v17 }
 0x10e   : > { %v1009_v2 = vpop.f32.mrf.mxu0  ;;  %v1032_v3 = vpop.f32.mrf.mxu1 }
 0x10f   : > { %1875 = vst.msk [vmem:[%s2520_s23 + $0x1c8] sm:$0xff] %vm1817_vm1, %v1009_v2  ;;  %v1055_v5 = vpop.f32.mrf.mxu2  ;;  %v1078_v6 = vpop.f32.mrf.mxu3 }
 0x110   : > { %1877 = vst.msk [vmem:[%s2520_s23 + $0x1d8] sm:$0xff] %vm1817_vm1, %v1032_v3 }
 0x111   : > { %1879 = vst.msk [vmem:[%s2520_s23 + $0x1e8] sm:$0xff] %vm1817_vm1, %v1055_v5  ;;  %2186 = vmatmul.msk.f32.gmra.mxu0 %vm338_vm0, %v2323_v17  ;;  %2188 = vmatmul.msk.f32.gmra.mxu1 %vm338_vm0, %v2323_v17 }
 0x112   : > { %1881 = vst.msk [vmem:[%s2520_s23 + $0x1f8] sm:$0xff] %vm1817_vm1, %v1078_v6 }
 0x116   : > { %v1098_v4 = vpop.f32.mrf.mxu0  ;;  %v1121_v7 = vpop.f32.mrf.mxu1 }
 0x117   : > { %1882 = vst.msk [vmem:[%s2520_s23 + $0x200] sm:$0xff] %vm1817_vm1, %v1098_v4  ;;  %v1144_v8 = vpop.f32.mrf.mxu2  ;;  %v1167_v9 = vpop.f32.mrf.mxu3 }
 0x118   : > { %1884 = vst.msk [vmem:[%s2520_s23 + $0x210] sm:$0xff] %vm1817_vm1, %v1121_v7 }
 0x119   : > { %1886 = vst.msk [vmem:[%s2520_s23 + $0x220] sm:$0xff] %vm1817_vm1, %v1144_v8 }
 0x11a   : > { %1888 = vst.msk [vmem:[%s2520_s23 + $0x230] sm:$0xff] %vm1817_vm1, %v1167_v9 }
 0x11e   : > { %v1101_v17 = vpop.f32.mrf.mxu0  ;;  %v1124_v10 = vpop.f32.mrf.mxu1 }
 0x11f   : > { %1883 = vst.msk [vmem:[%s2520_s23 + $0x208] sm:$0xff] %vm1817_vm1, %v1101_v17  ;;  %v1147_v11 = vpop.f32.mrf.mxu2  ;;  %v1170_v12 = vpop.f32.mrf.mxu3 }
 0x120   : > { %1885 = vst.msk [vmem:[%s2520_s23 + $0x218] sm:$0xff] %vm1817_vm1, %v1124_v10 }
 0x121   : > { %1887 = vst.msk [vmem:[%s2520_s23 + $0x228] sm:$0xff] %vm1817_vm1, %v1147_v11 }
 0x122   : > { %1889 = vst.msk [vmem:[%s2520_s23 + $0x238] sm:$0xff] %vm1817_vm1, %v1170_v12 }
 0x126   : > { %v1190_v13 = vpop.f32.mrf.mxu0  ;;  %v1213_v14 = vpop.f32.mrf.mxu1 }
 0x127   : > { %1890 = vst.msk [vmem:[%s2520_s23 + $0x240] sm:$0xff] %vm1817_vm1, %v1190_v13  ;;  %v1236_v15 = vpop.f32.mrf.mxu2  ;;  %v1259_v16 = vpop.f32.mrf.mxu3 }
 0x128   : > { %1892 = vst.msk [vmem:[%s2520_s23 + $0x250] sm:$0xff] %vm1817_vm1, %v1213_v14 }
 0x129   : > { %1894 = vst.msk [vmem:[%s2520_s23 + $0x260] sm:$0xff] %vm1817_vm1, %v1236_v15 }
 0x12a   : > { %1896 = vst.msk [vmem:[%s2520_s23 + $0x270] sm:$0xff] %vm1817_vm1, %v1259_v16 }
 0x12e   : > { %v1193_v18 = vpop.f32.mrf.mxu0  ;;  %v1216_v19 = vpop.f32.mrf.mxu1 }
 0x12f   : > { %1891 = vst.msk [vmem:[%s2520_s23 + $0x248] sm:$0xff] %vm1817_vm1, %v1193_v18  ;;  %v1239_v20 = vpop.f32.mrf.mxu2  ;;  %v1262_v21 = vpop.f32.mrf.mxu3 }
 0x130   : > { %1893 = vst.msk [vmem:[%s2520_s23 + $0x258] sm:$0xff] %vm1817_vm1, %v1216_v19 }
 0x131   : > { %1895 = vst.msk [vmem:[%s2520_s23 + $0x268] sm:$0xff] %vm1817_vm1, %v1239_v20 }
 0x132   : > { %1897 = vst.msk [vmem:[%s2520_s23 + $0x278] sm:$0xff] %vm1817_vm1, %v1262_v21 }
 0x136   : > { %v1282_v22 = vpop.f32.mrf.mxu0  ;;  %v1305_v23 = vpop.f32.mrf.mxu1 }
 0x137   : > { %1898 = vst.msk [vmem:[%s2520_s23 + $0x280] sm:$0xff] %vm1817_vm1, %v1282_v22  ;;  %v1328_v24 = vpop.f32.mrf.mxu2  ;;  %v1351_v25 = vpop.f32.mrf.mxu3 }
 0x138   : > { %1900 = vst.msk [vmem:[%s2520_s23 + $0x290] sm:$0xff] %vm1817_vm1, %v1305_v23 }
 0x139   : > { %1902 = vst.msk [vmem:[%s2520_s23 + $0x2a0] sm:$0xff] %vm1817_vm1, %v1328_v24 }
 0x13a   : > { %1904 = vst.msk [vmem:[%s2520_s23 + $0x2b0] sm:$0xff] %vm1817_vm1, %v1351_v25 }
 0x13e   : > { %v1285_v26 = vpop.f32.mrf.mxu0  ;;  %v1308_v27 = vpop.f32.mrf.mxu1 }
 0x13f   : > { %1899 = vst.msk [vmem:[%s2520_s23 + $0x288] sm:$0xff] %vm1817_vm1, %v1285_v26  ;;  %v1331_v28 = vpop.f32.mrf.mxu2  ;;  %v1354_v29 = vpop.f32.mrf.mxu3 }
 0x140   : > { %1901 = vst.msk [vmem:[%s2520_s23 + $0x298] sm:$0xff] %vm1817_vm1, %v1308_v27 }
 0x141   : > { %1903 = vst.msk [vmem:[%s2520_s23 + $0x2a8] sm:$0xff] %vm1817_vm1, %v1331_v28 }
 0x142   : > { %1905 = vst.msk [vmem:[%s2520_s23 + $0x2b8] sm:$0xff] %vm1817_vm1, %v1354_v29 }
 0x146   : > { %v1374_v30 = vpop.f32.mrf.mxu0  ;;  %v1397_v31 = vpop.f32.mrf.mxu1 }
 0x147   : > { %1906 = vst.msk [vmem:[%s2520_s23 + $0x2c0] sm:$0xff] %vm1817_vm1, %v1374_v30  ;;  %v1420_v32 = vpop.f32.mrf.mxu2  ;;  %v1443_v33 = vpop.f32.mrf.mxu3 }
 0x148   : > { %1908 = vst.msk [vmem:[%s2520_s23 + $0x2d0] sm:$0xff] %vm1817_vm1, %v1397_v31 }
 0x149   : > { %1910 = vst.msk [vmem:[%s2520_s23 + $0x2e0] sm:$0xff] %vm1817_vm1, %v1420_v32 }
 0x14a   : > { %1912 = vst.msk [vmem:[%s2520_s23 + $0x2f0] sm:$0xff] %vm1817_vm1, %v1443_v33 }
 0x14e   : > { %v1377_v34 = vpop.f32.mrf.mxu0  ;;  %v1400_v35 = vpop.f32.mrf.mxu1 }
 0x14f   : > { %1907 = vst.msk [vmem:[%s2520_s23 + $0x2c8] sm:$0xff] %vm1817_vm1, %v1377_v34  ;;  %v1423_v36 = vpop.f32.mrf.mxu2  ;;  %v1446_v37 = vpop.f32.mrf.mxu3 }
 0x150   : > { %1909 = vst.msk [vmem:[%s2520_s23 + $0x2d8] sm:$0xff] %vm1817_vm1, %v1400_v35 }
 0x151   : > { %1911 = vst.msk [vmem:[%s2520_s23 + $0x2e8] sm:$0xff] %vm1817_vm1, %v1423_v36 }
 0x152   : > { %1913 = vst.msk [vmem:[%s2520_s23 + $0x2f8] sm:$0xff] %vm1817_vm1, %v1446_v37 }
 0x156   : > { %v1466_v38 = vpop.f32.mrf.mxu0  ;;  %v1489_v39 = vpop.f32.mrf.mxu1 }
 0x157   : > { %1914 = vst.msk [vmem:[%s2520_s23 + $0x300] sm:$0xff] %vm1817_vm1, %v1466_v38  ;;  %v1512_v40 = vpop.f32.mrf.mxu2  ;;  %v1535_v41 = vpop.f32.mrf.mxu3 }
 0x158   : > { %1916 = vst.msk [vmem:[%s2520_s23 + $0x310] sm:$0xff] %vm1817_vm1, %v1489_v39 }
 0x159   : > { %1918 = vst.msk [vmem:[%s2520_s23 + $0x320] sm:$0xff] %vm1817_vm1, %v1512_v40 }
 0x15a   : > { %1920 = vst.msk [vmem:[%s2520_s23 + $0x330] sm:$0xff] %vm1817_vm1, %v1535_v41 }
 0x15e   : > { %v1469_v42 = vpop.f32.mrf.mxu0  ;;  %v1492_v43 = vpop.f32.mrf.mxu1 }
 0x15f   : > { %1915 = vst.msk [vmem:[%s2520_s23 + $0x308] sm:$0xff] %vm1817_vm1, %v1469_v42  ;;  %v1515_v44 = vpop.f32.mrf.mxu2  ;;  %v1538_v45 = vpop.f32.mrf.mxu3 }
 0x160   : > { %1917 = vst.msk [vmem:[%s2520_s23 + $0x318] sm:$0xff] %vm1817_vm1, %v1492_v43 }
 0x161   : > { %1919 = vst.msk [vmem:[%s2520_s23 + $0x328] sm:$0xff] %vm1817_vm1, %v1515_v44 }
 0x162   : > { %1921 = vst.msk [vmem:[%s2520_s23 + $0x338] sm:$0xff] %vm1817_vm1, %v1538_v45 }
 0x166   : > { %v1558_v46 = vpop.f32.mrf.mxu0  ;;  %v1581_v47 = vpop.f32.mrf.mxu1 }
 0x167   : > { %1922 = vst.msk [vmem:[%s2520_s23 + $0x340] sm:$0xff] %vm1817_vm1, %v1558_v46  ;;  %v1604_v48 = vpop.f32.mrf.mxu2  ;;  %v1627_v49 = vpop.f32.mrf.mxu3 }
 0x168   : > { %1924 = vst.msk [vmem:[%s2520_s23 + $0x350] sm:$0xff] %vm1817_vm1, %v1581_v47 }
 0x169   : > { %1926 = vst.msk [vmem:[%s2520_s23 + $0x360] sm:$0xff] %vm1817_vm1, %v1604_v48 }
 0x16a   : > { %1928 = vst.msk [vmem:[%s2520_s23 + $0x370] sm:$0xff] %vm1817_vm1, %v1627_v49 }
 0x16e   : > { %v1561_v50 = vpop.f32.mrf.mxu0  ;;  %v1584_v51 = vpop.f32.mrf.mxu1 }
 0x16f   : > { %1923 = vst.msk [vmem:[%s2520_s23 + $0x348] sm:$0xff] %vm1817_vm1, %v1561_v50  ;;  %v1607_v52 = vpop.f32.mrf.mxu2  ;;  %v1630_v53 = vpop.f32.mrf.mxu3 }
 0x170   : > { %1925 = vst.msk [vmem:[%s2520_s23 + $0x358] sm:$0xff] %vm1817_vm1, %v1584_v51 }
 0x171   : > { %1927 = vst.msk [vmem:[%s2520_s23 + $0x368] sm:$0xff] %vm1817_vm1, %v1607_v52 }
 0x172   : > { %1929 = vst.msk [vmem:[%s2520_s23 + $0x378] sm:$0xff] %vm1817_vm1, %v1630_v53 }
 0x176   : > { %v1650_v54 = vpop.f32.mrf.mxu0  ;;  %v1673_v55 = vpop.f32.mrf.mxu1 }
 0x177   : > { %1930 = vst.msk [vmem:[%s2520_s23 + $0x380] sm:$0xff] %vm1817_vm1, %v1650_v54  ;;  %v1696_v56 = vpop.f32.mrf.mxu2  ;;  %v1719_v57 = vpop.f32.mrf.mxu3 }
 0x178   : > { %1932 = vst.msk [vmem:[%s2520_s23 + $0x390] sm:$0xff] %vm1817_vm1, %v1673_v55 }
 0x179   : > { %1934 = vst.msk [vmem:[%s2520_s23 + $0x3a0] sm:$0xff] %vm1817_vm1, %v1696_v56 }
 0x17a   : > { %1936 = vst.msk [vmem:[%s2520_s23 + $0x3b0] sm:$0xff] %vm1817_vm1, %v1719_v57 }
 0x17e   : > { %v1653_v58 = vpop.f32.mrf.mxu0  ;;  %v1676_v59 = vpop.f32.mrf.mxu1 }
 0x17f   : > { %1931 = vst.msk [vmem:[%s2520_s23 + $0x388] sm:$0xff] %vm1817_vm1, %v1653_v58  ;;  %v1699_v60 = vpop.f32.mrf.mxu2  ;;  %v1722_v61 = vpop.f32.mrf.mxu3 }
 0x180   : > { %1933 = vst.msk [vmem:[%s2520_s23 + $0x398] sm:$0xff] %vm1817_vm1, %v1676_v59 }
 0x181   : > { %1935 = vst.msk [vmem:[%s2520_s23 + $0x3a8] sm:$0xff] %vm1817_vm1, %v1699_v60 }
 0x182   : > { %1937 = vst.msk [vmem:[%s2520_s23 + $0x3b8] sm:$0xff] %vm1817_vm1, %v1722_v61 }
 0x186   : > { %v1742_v62 = vpop.f32.mrf.mxu0  ;;  %v1765_v63 = vpop.f32.mrf.mxu1 }
 0x187   : > { %1938 = vst.msk [vmem:[%s2520_s23 + $0x3c0] sm:$0xff] %vm1817_vm1, %v1742_v62  ;;  %v1788_v0 = vpop.f32.mrf.mxu2  ;;  %v1811_v1 = vpop.f32.mrf.mxu3 }
 0x188   : > { %1940 = vst.msk [vmem:[%s2520_s23 + $0x3d0] sm:$0xff] %vm1817_vm1, %v1765_v63 }
 0x189   : > { %1942 = vst.msk [vmem:[%s2520_s23 + $0x3e0] sm:$0xff] %vm1817_vm1, %v1788_v0 }
 0x18a   : > { %1944 = vst.msk [vmem:[%s2520_s23 + $0x3f0] sm:$0xff] %vm1817_vm1, %v1811_v1 }
 0x18e   : > { %v1745_v2 = vpop.f32.mrf.mxu0  ;;  %v1768_v3 = vpop.f32.mrf.mxu1 }
 0x18f   : > { %1939 = vst.msk [vmem:[%s2520_s23 + $0x3c8] sm:$0xff] %vm1817_vm1, %v1745_v2  ;;  %v1791_v5 = vpop.f32.mrf.mxu2  ;;  %v1814_v6 = vpop.f32.mrf.mxu3 }
 0x190   : > { %1941 = vst.msk [vmem:[%s2520_s23 + $0x3d8] sm:$0xff] %vm1817_vm1, %v1768_v3 }
 0x191   : > { %1943 = vst.msk [vmem:[%s2520_s23 + $0x3e8] sm:$0xff] %vm1817_vm1, %v1791_v5 }
 0x192   : > { %1945 = vst.msk [vmem:[%s2520_s23 + $0x3f8] sm:$0xff] %vm1817_vm1, %v1814_v6 }
 0x193 PF: > { %s12_s11 = sadd.s32 1, %s2244_s11   ;;  %s2960_s9 = smov %s2240_s10 }
 0x194   : > { %p9_p5 = scmp.ge.s32.totalorder %s12_s11, 4   ;;  %s2961_s10 = smov %s2963_s12 }
 0x196   :  { %11 = sbr.rel (!%p9_p5) target bundleno = 2 (0x2), region = 61 }

</bundles_post_ra>
